<compile_context>
chip_gen: v5e
topology: v5e:2x2
jax: 0.10.0
libtpu: 0.0.40
codegen_flags: <defaults>
</compile_context>

<pallas_src>
import math
from functools import partial

import jax
import jax.numpy as jnp
from jax.experimental import pallas as pl
from jax.experimental.pallas import tpu as pltpu

_INV_SQRT2 = 1.0 / math.sqrt(2.0)
_SQRT_2_OVER_PI = math.sqrt(2.0 / math.pi)

# Default row tile: >= ~650 rows keeps the streaming (k-tiled) kernel MXU-bound on v6e
# (918 TF/s / 1.4 TB/s), and is well above the ~311-row v7x threshold.  The VMEM-fit
# shrink below may reduce it on 64 MiB/TC parts.  NOTE(v7x): for 768 < M < 1536 consider
# passing tm ~= M/2 so both TensorCores get a row tile of the "parallel" axis.
_DEFAULT_ROW_TILE = 768


# --------------------------------------------------------------------------------------
# small helpers
# --------------------------------------------------------------------------------------
def _round_up(x, m):
    return (x + m - 1) // m * m


def _pad_axis(a, axis, new_size):
    pad = new_size - a.shape[axis]
    if pad <= 0:
        return a
    widths = [(0, 0)] * a.ndim
    widths[axis] = (0, pad)
    return jnp.pad(a, widths)


def _compute_dtype(dtype):
    # bf16 operands keep both matmuls on the fast MXU path; accumulation stays f32.
    return jnp.dtype(jnp.bfloat16) if jnp.dtype(dtype) == jnp.dtype(jnp.float32) else jnp.dtype(dtype)


def _gelu_f32(h, approx):
    if approx:
        # tanh-GELU: exp/tanh run on the otherwise-idle EUP slot (v6e/v7x), ~1e-3 deviation.
        inner = _SQRT_2_OVER_PI * (h + 0.044715 * h * h * h)
        return 0.5 * h * (1.0 + jnp.tanh(inner))
    # exact erf == torch.nn.GELU default
    return 0.5 * h * (1.0 + jax.lax.erf(h * _INV_SQRT2))


def _vmem_capacity_bytes():
    try:
        return int(pltpu.get_tpu_info().vmem_capacity_bytes)
    except Exception:
        return 64 * 1024 * 1024  # conservative: v7x per-TC VMEM


def _pick_intermed_tile(intermed, cap=512):
    """Reduction tile for the streaming path. Must divide intermed and be a multiple of
    128 (or equal intermed). Prefer >= 512 to amortize the ~0.35us per-grid-step overhead
    and 256-multiples for the v6e/v7x 2x256x256 MXU."""
    if intermed <= cap:
        return intermed
    for t in (512, 256, 384, 128):
        if t <= cap and intermed % t == 0:
            return t
    start = cap - (cap % 128)
    for t in range(start, 0, -128):
        if intermed % t == 0:
            return t
    return intermed  # odd intermed: single k step (may be VMEM-heavy, rare)


def _plan_tiles(M, hidden_pad, intermed, x_itemsize, w_itemsize,
                tm=None, tn=None, force_tiled=False):
    """Pick (resident?, tm, tn, vmem_limit). The estimate counts double-buffered pipeline
    tiles, weights, the f32 (tm, k)-sized intermediates and bias rows, then shrinks tm
    until it fits ~80% of per-core VMEM."""
    cap = _vmem_capacity_bytes()
    budget = int(cap * 0.8)
    align = 16 if x_itemsize == 2 else 8  # bf16 packs 2 rows/sublane -> 16-row alignment

    def clamp_tm(t):
        t = min(t, M)
        if t < M:
            t = max(align, (t // align) * align)
        return t

    def est(tm_, kdim, resident):
        tiles = 2 * tm_ * hidden_pad * (2 * x_itemsize)            # x + out, double-buffered
        if resident:
            w = 2 * (2 * hidden_pad * intermed) * w_itemsize        # W1 + W2, whole arrays
        else:
            w = 2 * (2 * hidden_pad * kdim) * w_itemsize            # per-k tiles, double-buffered
        inter = tm_ * kdim * 6                                      # h (f32) + gelu out (~2B)
        extra = tm_ * hidden_pad * 4                                # f32 acc / LN intermediates
        bias = 2 * (intermed + hidden_pad) * w_itemsize
        return tiles + w + inter + extra + bias

    def shrink_to_fit(tm_, kdim, resident):
        while tm_ > align and est(tm_, kdim, resident) > budget:
            nt = max(align, ((tm_ // 2) // align) * align)
            if nt == tm_:
                break
            tm_ = nt
        return tm_

    def limit_for(e):
        return int(min(0.9 * cap, max(1.5 * e, 32 * 1024 * 1024)))

    tm0 = clamp_tm(tm if tm is not None else _DEFAULT_ROW_TILE)

    if not force_tiled:
        tm_r = shrink_to_fit(tm0, intermed, True)
        e = est(tm_r, intermed, True)
        if e <= budget:
            return {"resident": True, "tm": tm_r, "tn": intermed, "vmem_limit": limit_for(e)}

    tn_ = tn if tn is not None else _pick_intermed_tile(intermed)
    assert intermed % tn_ == 0, "intermed tile must divide intermed_size"
    assert tn_ % 128 == 0 or tn_ == intermed, "intermed tile must be a multiple of 128"
    tm_t = shrink_to_fit(tm0, tn_, False)
    e = est(tm_t, tn_, False)
    return {"resident": False, "tm": tm_t, "tn": tn_, "vmem_limit": limit_for(e)}


# --------------------------------------------------------------------------------------
# kernels
# --------------------------------------------------------------------------------------
def ffn_resident_kernel(x_ref, w1_ref, b1_ref, w2_ref, b2_ref, o_ref, *,
                        approx_gelu, compute_dtype):
    # Weights have constant index_maps -> DMA'd once, VMEM-resident across row tiles.
    h = jnp.dot(x_ref[...], w1_ref[...], preferred_element_type=jnp.float32)
    h = h + b1_ref[...].astype(jnp.float32)
    a = _gelu_f32(h, approx_gelu).astype(compute_dtype)
    y = jnp.dot(a, w2_ref[...], preferred_element_type=jnp.float32)
    o_ref[...] = (y + b2_ref[...].astype(jnp.float32)).astype(o_ref.dtype)


def ffn_tiled_kernel(x_ref, w1_ref, b1_ref, w2_ref, b2_ref, o_ref, acc_ref, *,
                     approx_gelu, compute_dtype):
    # Streaming fallback: intermed dimension tiled, f32 accumulator in VMEM scratch.
    # TODO(synk): if weight DMA is still exposed on v7x, add pipeline_mode=pl.Buffered(3)
    # to the W1/W2 BlockSpecs.
    k = pl.program_id(1)

    @pl.when(k == 0)
    def _init():
        acc_ref[...] = jnp.zeros_like(acc_ref)

    h = jnp.dot(x_ref[...], w1_ref[...], preferred_element_type=jnp.float32)
    h = h + b1_ref[...].astype(jnp.float32)
    a = _gelu_f32(h, approx_gelu).astype(compute_dtype)
    acc_ref[...] += jnp.dot(a, w2_ref[...], preferred_element_type=jnp.float32)

    @pl.when(k == pl.num_programs(1) - 1)
    def _store():
        o_ref[...] = (acc_ref[...] + b2_ref[...].astype(jnp.float32)).astype(o_ref.dtype)


def ln_ffn_residual_kernel(states_ref, gamma_ref, beta_ref, w1_ref, b1_ref, w2_ref, b2_ref,
                           o_ref, *, eps, hidden_true, approx_gelu, compute_dtype):
    # Fused norm2 -> FFN -> residual on one row tile; weights VMEM-resident.
    s = states_ref[...].astype(jnp.float32)
    hp = s.shape[-1]
    inv_h = 1.0 / float(hidden_true)
    mu = jnp.sum(s, axis=-1, keepdims=True) * inv_h   # padded lanes are zero
    d = s - mu
    if hidden_true != hp:
        lane_valid = jax.lax.broadcasted_iota(jnp.int32, (1, hp), 1) < hidden_true
        d = jnp.where(lane_valid, d, 0.0)
    var = jnp.sum(d * d, axis=-1, keepdims=True) * inv_h
    normed = d * jax.lax.rsqrt(var + eps) * gamma_ref[...].astype(jnp.float32) \
             + beta_ref[...].astype(jnp.float32)

    x = normed.astype(compute_dtype)
    h = jnp.dot(x, w1_ref[...], preferred_element_type=jnp.float32)
    h = h + b1_ref[...].astype(jnp.float32)
    a = _gelu_f32(h, approx_gelu).astype(compute_dtype)
    y = jnp.dot(a, w2_ref[...], preferred_element_type=jnp.float32)
    y = y + b2_ref[...].astype(jnp.float32)

    o_ref[...] = (s + y).astype(o_ref.dtype)          # residual add in f32


# --------------------------------------------------------------------------------------
# wrappers
# --------------------------------------------------------------------------------------
def ffn_forward(x, w1, b1, w2, b2, *, tm=None, tn=None, gelu_approx=True,
                force_tiled=False, vmem_limit_bytes=None):
    """FFNComponent forward. x: [batch, seq, hidden]; w1: [hidden, intermed]; b1: [intermed];
       w2: [intermed, hidden]; b2: [hidden]. Returns [batch, seq, hidden]."""
    batch, seq, hidden = x.shape
    intermed = w1.shape[1]
    assert w1.shape[0] == hidden and w2.shape == (intermed, hidden)
    M = batch * seq

    # Lane-dense output: pad hidden up to a multiple of 128 (zero pad keeps math exact).
    hidden_pad = _round_up(hidden, 128)
    x2d = x.reshape(M, hidden)
    if hidden_pad != hidden:
        x2d = _pad_axis(x2d, 1, hidden_pad)
        w1 = _pad_axis(w1, 0, hidden_pad)
        w2 = _pad_axis(w2, 1, hidden_pad)
        b2 = _pad_axis(b2, 0, hidden_pad)
    b1_2d = b1.reshape(1, intermed)
    b2_2d = b2.reshape(1, hidden_pad)

    compute_dtype = _compute_dtype(x.dtype)
    plan = _plan_tiles(M, hidden_pad, intermed,
                       jnp.dtype(x.dtype).itemsize, jnp.dtype(w1.dtype).itemsize,
                       tm=tm, tn=tn, force_tiled=force_tiled)
    tm_, tn_ = plan["tm"], plan["tn"]
    limit = plan["vmem_limit"] if vmem_limit_bytes is None else vmem_limit_bytes

    if plan["resident"]:
        out2d = pl.pallas_call(
            partial(ffn_resident_kernel, approx_gelu=gelu_approx, compute_dtype=compute_dtype),
            out_shape=jax.ShapeDtypeStruct((M, hidden_pad), x.dtype),
            grid=(pl.cdiv(M, tm_),),
            in_specs=[
                pl.BlockSpec((tm_, hidden_pad), lambda i: (i, 0)),       # x row tile
                pl.BlockSpec((hidden_pad, intermed), lambda i: (0, 0)),  # W1 (resident)
                pl.BlockSpec((1, intermed), lambda i: (0, 0)),           # b1
                pl.BlockSpec((intermed, hidden_pad), lambda i: (0, 0)),  # W2 (resident)
                pl.BlockSpec((1, hidden_pad), lambda i: (0, 0)),         # b2
            ],
            out_specs=pl.BlockSpec((tm_, hidden_pad), lambda i: (i, 0)),
            compiler_params=pltpu.CompilerParams(
                dimension_semantics=("parallel",),
                vmem_limit_bytes=limit),
        )(x2d, w1, b1_2d, w2, b2_2d)
    else:
        grid = (pl.cdiv(M, tm_), intermed // tn_)
        out2d = pl.pallas_call(
            partial(ffn_tiled_kernel, approx_gelu=gelu_approx, compute_dtype=compute_dtype),
            out_shape=jax.ShapeDtypeStruct((M, hidden_pad), x.dtype),
            grid=grid,
            in_specs=[
                pl.BlockSpec((tm_, hidden_pad), lambda i, k: (i, 0)),    # x row tile
                pl.BlockSpec((hidden_pad, tn_), lambda i, k: (0, k)),    # W1 column tile
                pl.BlockSpec((1, tn_), lambda i, k: (0, k)),             # b1 tile
                pl.BlockSpec((tn_, hidden_pad), lambda i, k: (k, 0)),    # W2 row tile
                pl.BlockSpec((1, hidden_pad), lambda i, k: (0, 0)),      # b2 (finalize only)
            ],
            out_specs=pl.BlockSpec((tm_, hidden_pad), lambda i, k: (i, 0)),
            scratch_shapes=[pltpu.VMEM((tm_, hidden_pad), jnp.float32)],
            compiler_params=pltpu.CompilerParams(
                dimension_semantics=("parallel", "arbitrary"),
                vmem_limit_bytes=limit),
        )(x2d, w1, b1_2d, w2, b2_2d)

    if hidden_pad != hidden:
        out2d = out2d[:, :hidden]
    return out2d.reshape(batch, seq, hidden)


def transformer_ffn_sublayer(states, ln_gamma, ln_beta, w1, b1, w2, b2, *, eps=1e-12,
                             tm=None, gelu_approx=True, vmem_limit_bytes=None):
    """TransformerLayer FFN sub-block (non-LMA path):
         states + dropout(ffn(norm2(states)))   with dropout == identity (inference),
       fused into a single Pallas kernel (LayerNorm + FFN + residual) when the weights
       fit in VMEM; otherwise LN/residual stay in XLA around the streaming FFN kernel."""
    # TODO(synk): the attention sub-block (get_attention_mechanism / LMA variants) is
    # unspecified in the reference module, so it is not implemented here.
    batch, seq, hidden = states.shape
    intermed = w1.shape[1]
    assert w1.shape[0] == hidden and w2.shape == (intermed, hidden)
    M = batch * seq
    hidden_pad = _round_up(hidden, 128)
    compute_dtype = _compute_dtype(states.dtype)

    plan = _plan_tiles(M, hidden_pad, intermed,
                       jnp.dtype(states.dtype).itemsize, jnp.dtype(w1.dtype).itemsize, tm=tm)
    if not plan["resident"]:
        # Weights too large for VMEM residency: unfused fallback.
        xf = states.astype(jnp.float32)
        mu = jnp.mean(xf, axis=-1, keepdims=True)
        var = jnp.mean(jnp.square(xf - mu), axis=-1, keepdims=True)
        normed = ((xf - mu) * jax.lax.rsqrt(var + eps) * ln_gamma + ln_beta).astype(states.dtype)
        return states + ffn_forward(normed, w1, b1, w2, b2, tm=tm, gelu_approx=gelu_approx,
                                    vmem_limit_bytes=vmem_limit_bytes)

    s2d = states.reshape(M, hidden)
    g2d = ln_gamma.reshape(1, hidden).astype(jnp.float32)
    bt2d = ln_beta.reshape(1, hidden).astype(jnp.float32)
    if hidden_pad != hidden:
        s2d = _pad_axis(s2d, 1, hidden_pad)
        g2d = _pad_axis(g2d, 1, hidden_pad)
        bt2d = _pad_axis(bt2d, 1, hidden_pad)
        w1 = _pad_axis(w1, 0, hidden_pad)
        w2 = _pad_axis(w2, 1, hidden_pad)
        b2 = _pad_axis(b2, 0, hidden_pad)
    b1_2d = b1.reshape(1, intermed)
    b2_2d = b2.reshape(1, hidden_pad)

    tm_ = plan["tm"]
    limit = plan["vmem_limit"] if vmem_limit_bytes is None else vmem_limit_bytes

    out2d = pl.pallas_call(
        partial(ln_ffn_residual_kernel, eps=eps, hidden_true=hidden,
                approx_gelu=gelu_approx, compute_dtype=compute_dtype),
        out_shape=jax.ShapeDtypeStruct((M, hidden_pad), states.dtype),
        grid=(pl.cdiv(M, tm_),),
        in_specs=[
            pl.BlockSpec((tm_, hidden_pad), lambda i: (i, 0)),        # states row tile
            pl.BlockSpec((1, hidden_pad), lambda i: (0, 0)),          # LN gamma
            pl.BlockSpec((1, hidden_pad), lambda i: (0, 0)),          # LN beta
            pl.BlockSpec((hidden_pad, intermed), lambda i: (0, 0)),   # W1 (resident)
            pl.BlockSpec((1, intermed), lambda i: (0, 0)),            # b1
            pl.BlockSpec((intermed, hidden_pad), lambda i: (0, 0)),   # W2 (resident)
            pl.BlockSpec((1, hidden_pad), lambda i: (0, 0)),          # b2
        ],
        out_specs=pl.BlockSpec((tm_, hidden_pad), lambda i: (i, 0)),
        compiler_params=pltpu.CompilerParams(
            dimension_semantics=("parallel",),
            vmem_limit_bytes=limit),
    )(s2d, g2d, bt2d, w1, b1_2d, w2, b2_2d)

    if hidden_pad != hidden:
        out2d = out2d[:, :hidden]
    return out2d.reshape(batch, seq, hidden)


# --------------------------------------------------------------------------------------
# pure-JAX references (dtype-matched: native operands, f32 accumulation)
# --------------------------------------------------------------------------------------
def _ffn_reference(x, w1, b1, w2, b2, *, approx=True):
    B, S, H = x.shape
    cd = _compute_dtype(x.dtype)
    x2d = x.reshape(B * S, H)
    h = jnp.dot(x2d, w1, preferred_element_type=jnp.float32) + b1.astype(jnp.float32)
    a = _gelu_f32(h, approx).astype(cd)
    y = jnp.dot(a, w2, preferred_element_type=jnp.float32) + b2.astype(jnp.float32)
    return y.astype(x.dtype).reshape(B, S, H)


def _sublayer_reference(states, gamma, beta, w1, b1, w2, b2, *, eps=1e-12, approx=True):
    B, S, H = states.shape
    cd = _compute_dtype(states.dtype)
    s = states.astype(jnp.float32)
    mu = jnp.mean(s, axis=-1, keepdims=True)
    var = jnp.mean(jnp.square(s - mu), axis=-1, keepdims=True)
    normed = (s - mu) * jax.lax.rsqrt(var + eps) * gamma.astype(jnp.float32) + beta.astype(jnp.float32)
    x2d = normed.astype(cd).reshape(B * S, H)
    h = jnp.dot(x2d, w1, preferred_element_type=jnp.float32) + b1.astype(jnp.float32)
    a = _gelu_f32(h, approx).astype(cd)
    y = jnp.dot(a, w2, preferred_element_type=jnp.float32) + b2.astype(jnp.float32)
    out = (s.reshape(B * S, H) + y).astype(states.dtype)
    return out.reshape(B, S, H)


def _make_params(key, hidden, intermed, dtype):
    kx, kw1, kb1, kw2, kb2 = jax.random.split(key, 5)
    bound1 = 1.0 / math.sqrt(hidden)
    bound2 = 1.0 / math.sqrt(intermed)
    w1 = jax.random.uniform(kw1, (hidden, intermed), jnp.float32,
                            minval=-bound1, maxval=bound1).astype(dtype)   # dense_in.weight.T
    b1 = jax.random.uniform(kb1, (intermed,), jnp.float32,
                            minval=-bound1, maxval=bound1).astype(dtype)   # dense_in.bias
    w2 = jax.random.uniform(kw2, (intermed, hidden), jnp.float32,
                            minval=-bound2, maxval=bound2).astype(dtype)   # dense_out.weight.T
    b2 = jax.random.uniform(kb2, (hidden,), jnp.float32,
                            minval=-bound2, maxval=bound2).astype(dtype)   # dense_out.bias
    return kx, w1, b1, w2, b2


if __name__ == "__main__":
    dtype = jnp.bfloat16
    key = jax.random.PRNGKey(0)
    k_small, k_big, k_ln = jax.random.split(key, 3)

    # ---- Small shapes implied by the module (hidden=32 -> padded to 128 lanes) ----
    batch, seq, hidden_size, intermed_size = 2, 8, 32, 128
    kx, w1, b1, w2, b2 = _make_params(k_small, hidden_size, intermed_size, dtype)
    x = jax.random.normal(kx, (batch, seq, hidden_size), jnp.float32).astype(dtype)

    # Weight-resident path, tanh GELU (default)
    out = ffn_forward(x, w1, b1, w2, b2)
    jax.block_until_ready(out)
    ref = _ffn_reference(x, w1, b1, w2, b2, approx=True)
    assert out.shape == (batch, seq, hidden_size) and out.dtype == dtype
    assert jnp.allclose(out.astype(jnp.float32), ref.astype(jnp.float32), atol=2e-2, rtol=2e-2)

    # Exact-erf GELU branch
    out_e = ffn_forward(x, w1, b1, w2, b2, gelu_approx=False)
    jax.block_until_ready(out_e)
    ref_e = _ffn_reference(x, w1, b1, w2, b2, approx=False)
    assert jnp.allclose(out_e.astype(jnp.float32), ref_e.astype(jnp.float32), atol=2e-2, rtol=2e-2)

    # ---- Streaming (k-tiled) fallback path: multiple row tiles + multi-step reduction ----
    b2_, s2_, h2_, i2_ = 2, 64, 128, 512
    kx2, w1b, b1b, w2b, b2b = _make_params(k_big, h2_, i2_, dtype)
    x2 = jax.random.normal(kx2, (b2_, s2_, h2_), jnp.float32).astype(dtype)
    out2 = ffn_forward(x2, w1b, b1b, w2b, b2b, tm=64, tn=256, force_tiled=True)
    jax.block_until_ready(out2)
    ref2 = _ffn_reference(x2, w1b, b1b, w2b, b2b, approx=True)
    assert jnp.allclose(out2.astype(jnp.float32), ref2.astype(jnp.float32), atol=2e-2, rtol=2e-2)

    # ---- Fused TransformerLayer FFN sub-block: norm2 -> FFN -> residual in one kernel ----
    kg, kb = jax.random.split(k_ln, 2)
    gamma = 1.0 + 0.1 * jax.random.normal(kg, (hidden_size,), jnp.float32)
    beta = 0.1 * jax.random.normal(kb, (hidden_size,), jnp.float32)
    sub = transformer_ffn_sublayer(x, gamma, beta, w1, b1, w2, b2)
    jax.block_until_ready(sub)
    sub_ref = _sublayer_reference(x, gamma, beta, w1, b1, w2, b2, approx=True)
    assert sub.shape == x.shape and sub.dtype == dtype
    assert jnp.allclose(sub.astype(jnp.float32), sub_ref.astype(jnp.float32), atol=2e-2, rtol=2e-2)
    assert bool(jnp.all(jnp.isfinite(sub.astype(jnp.float32))))

    print("KERNEL_OK")
</pallas_src>

<mosaic_0001>
module attributes {stable_mosaic.version = 11 : i64} {
  func.func @ffn_resident_kernel(%arg0: i32, %arg1: memref<16x128xbf16, #tpu.memory_space<vmem>>, %arg2: memref<128x128xbf16, #tpu.memory_space<vmem>>, %arg3: memref<1x128xbf16, #tpu.memory_space<vmem>>, %arg4: memref<128x128xbf16, #tpu.memory_space<vmem>>, %arg5: memref<1x128xbf16, #tpu.memory_space<vmem>>, %arg6: memref<16x128xbf16, #tpu.memory_space<vmem>>) attributes {dimension_semantics = [#tpu.dimension_semantics<parallel>], iteration_bounds = array<i64: 1>, scalar_prefetch = 0 : i64, scratch_operands = 0 : i64, tpu.core_type = #tpu.core_type<tc>, window_params = [{transform_indices = @transform_0, window_bounds = array<i64: 16, 128>}, {pipeline_mode = #tpu.pipeline_mode<synchronous>, transform_indices = @transform_1, window_bounds = array<i64: 128, 128>}, {pipeline_mode = #tpu.pipeline_mode<synchronous>, transform_indices = @transform_2, window_bounds = array<i64: 1, 128>}, {pipeline_mode = #tpu.pipeline_mode<synchronous>, transform_indices = @transform_3, window_bounds = array<i64: 128, 128>}, {pipeline_mode = #tpu.pipeline_mode<synchronous>, transform_indices = @transform_4, window_bounds = array<i64: 1, 128>}, {transform_indices = @transform_5, window_bounds = array<i64: 16, 128>}]} {
    %c0 = arith.constant 0 : index
    %c0_0 = arith.constant 0 : index
    %0 = vector.load %arg1[%c0, %c0_0] : memref<16x128xbf16, #tpu.memory_space<vmem>>, vector<16x128xbf16>
    %c0_1 = arith.constant 0 : index
    %c0_2 = arith.constant 0 : index
    %1 = vector.load %arg2[%c0_1, %c0_2] : memref<128x128xbf16, #tpu.memory_space<vmem>>, vector<128x128xbf16>
    %cst = arith.constant dense<0.000000e+00> : vector<16x128xf32>
    %2 = tpu.matmul %0, %1, %cst {dimension_numbers = #tpu.dot_dimension_numbers<[1], [0], [0], [1], [0, 0, 1, 1], [], []>} : vector<16x128xbf16>, vector<128x128xbf16>, vector<16x128xf32> -> vector<16x128xf32>
    %c0_3 = arith.constant 0 : index
    %c0_4 = arith.constant 0 : index
    %3 = vector.load %arg3[%c0_3, %c0_4] : memref<1x128xbf16, #tpu.memory_space<vmem>>, vector<1x128xbf16>
    %4 = arith.extf %3 : vector<1x128xbf16> to vector<1x128xf32>
    %5 = vector.broadcast %4 : vector<1x128xf32> to vector<16x128xf32>
    %6 = arith.addf %2, %5 : vector<16x128xf32>
    %cst_5 = arith.constant 4.471500e-02 : f32
    %7 = vector.broadcast %cst_5 : f32 to vector<16x128xf32>
    %8 = arith.mulf %7, %6 : vector<16x128xf32>
    %9 = arith.mulf %8, %6 : vector<16x128xf32>
    %10 = arith.mulf %9, %6 : vector<16x128xf32>
    %11 = arith.addf %6, %10 : vector<16x128xf32>
    %cst_6 = arith.constant 0.797884583 : f32
    %12 = vector.broadcast %cst_6 : f32 to vector<16x128xf32>
    %13 = arith.mulf %12, %11 : vector<16x128xf32>
    %cst_7 = arith.constant 5.000000e-01 : f32
    %14 = vector.broadcast %cst_7 : f32 to vector<16x128xf32>
    %15 = arith.mulf %14, %6 : vector<16x128xf32>
    %16 = math.tanh %13 : vector<16x128xf32>
    %cst_8 = arith.constant 1.000000e+00 : f32
    %17 = vector.broadcast %cst_8 : f32 to vector<16x128xf32>
    %18 = arith.addf %17, %16 : vector<16x128xf32>
    %19 = arith.mulf %15, %18 : vector<16x128xf32>
    %20 = arith.truncf %19 : vector<16x128xf32> to vector<16x128xbf16>
    %c0_9 = arith.constant 0 : index
    %c0_10 = arith.constant 0 : index
    %21 = vector.load %arg4[%c0_9, %c0_10] : memref<128x128xbf16, #tpu.memory_space<vmem>>, vector<128x128xbf16>
    %cst_11 = arith.constant dense<0.000000e+00> : vector<16x128xf32>
    %22 = tpu.matmul %20, %21, %cst_11 {dimension_numbers = #tpu.dot_dimension_numbers<[1], [0], [0], [1], [0, 0, 1, 1], [], []>} : vector<16x128xbf16>, vector<128x128xbf16>, vector<16x128xf32> -> vector<16x128xf32>
    %c0_12 = arith.constant 0 : index
    %c0_13 = arith.constant 0 : index
    %23 = vector.load %arg5[%c0_12, %c0_13] : memref<1x128xbf16, #tpu.memory_space<vmem>>, vector<1x128xbf16>
    %24 = arith.extf %23 : vector<1x128xbf16> to vector<1x128xf32>
    %25 = vector.broadcast %24 : vector<1x128xf32> to vector<16x128xf32>
    %26 = arith.addf %22, %25 : vector<16x128xf32>
    %27 = arith.truncf %26 : vector<16x128xf32> to vector<16x128xbf16>
    %c0_14 = arith.constant 0 : index
    %c0_15 = arith.constant 0 : index
    %28 = vector.load %arg6[%c0_14, %c0_15] : memref<16x128xbf16, #tpu.memory_space<vmem>>, vector<16x128xbf16>
    tpu.vector_store %arg6[%c0_14, %c0_15], %27 {strides = array<i32>} : memref<16x128xbf16, #tpu.memory_space<vmem>>, vector<16x128xbf16>,
    return
  }
  func.func @transform_0(%arg0: i32) -> (i32, i32) {
    %c0_i32 = arith.constant 0 : i32
    %c0_i32_0 = arith.constant 0 : i32
    return %arg0, %c0_i32 : i32, i32
  }
  func.func @transform_1(%arg0: i32) -> (i32, i32) {
    %c0_i32 = arith.constant 0 : i32
    %c0_i32_0 = arith.constant 0 : i32
    %c0_i32_1 = arith.constant 0 : i32
    return %c0_i32, %c0_i32_0 : i32, i32
  }
  func.func @transform_2(%arg0: i32) -> (i32, i32) {
    %c0_i32 = arith.constant 0 : i32
    %c0_i32_0 = arith.constant 0 : i32
    %c0_i32_1 = arith.constant 0 : i32
    return %c0_i32, %c0_i32_0 : i32, i32
  }
  func.func @transform_3(%arg0: i32) -> (i32, i32) {
    %c0_i32 = arith.constant 0 : i32
    %c0_i32_0 = arith.constant 0 : i32
    %c0_i32_1 = arith.constant 0 : i32
    return %c0_i32, %c0_i32_0 : i32, i32
  }
  func.func @transform_4(%arg0: i32) -> (i32, i32) {
    %c0_i32 = arith.constant 0 : i32
    %c0_i32_0 = arith.constant 0 : i32
    %c0_i32_1 = arith.constant 0 : i32
    return %c0_i32, %c0_i32_0 : i32, i32
  }
  func.func @transform_5(%arg0: i32) -> (i32, i32) {
    %c0_i32 = arith.constant 0 : i32
    %c0_i32_0 = arith.constant 0 : i32
    return %arg0, %c0_i32 : i32, i32
  }
}

</mosaic_0001>

<bundles_post_ra>
// kernel: tpu_custom_call.1
= control target key start
LH: loop header
LB: loop body
LE: loop exit
PB: predicated region body
PF: predicated region fallthrough
CT: control target
= control target key end

     0   :  { %10 = vsyncpa [#allocation3], 0  ;;  %s549_s0 = inlined_call_operand.hbm [shape: bf16[16,128], index: 0, kind: input, shape index: {}]   ;;  %s550_s1 = inlined_call_operand.hbm [shape: bf16[128,128], index: 1, kind: input, shape index: {}]   ;;  %s551_s2 = inlined_call_operand.vmem [shape: bf16[1,128], index: 2, kind: input, shape index: {}]   ;;  %s552_s3 = inlined_call_operand.hbm [shape: bf16[128,128], index: 3, kind: input, shape index: {}]   ;;  %s553_s4 = inlined_call_operand.vmem [shape: bf16[1,128], index: 4, kind: input, shape index: {}]   ;;  %s554_s5 = inlined_call_operand.hbm [shape: bf16[16,128], index: 5, kind: output, shape index: {}]  }
   0x1   :  { %11 = vsyncpa [#allocation6], 0 }
   0x2   :  { %12 = vsyncpa [#allocation4], 0  ;;  %s30_s20 = sshll.u32 %s550_s1, 4  ;;  %s483_s21 = smov [#allocation5]   ;;  %s31_s20 = int_to_ptr.hbm [resolvable:$true] %s30_s20 }
   0x3   :  { %s32_s22 = sshll.u32 %s483_s21, 4  ;;  %s17_s25 = sshll.u32 %s549_s0, 4  ;;  %s33_s22 = int_to_ptr.vmem [resolvable:$true] %s32_s22  ;;  %s18_s25 = int_to_ptr.hbm [resolvable:$true] %s17_s25 }
   0x4   :  { %s484_s26 = smov 64   ;;  %s485_s27 = smov 4  }
   0x5   :  { %38 = dma.hbm_to_vmem [thread:$0]  %s31_s20, 1024, %s33_s22, [#allocation6], %s484_s26, %s484_s26, %s485_s27  }
   0x6   :  { %s486_s28 = smov [#allocation2]   ;;  %s45_s1 = sshll.u32 %s552_s3, 4  ;;  %s46_s1 = int_to_ptr.hbm [resolvable:$true] %s45_s1 }
   0x7   :  { %s19_s29 = sshll.u32 %s486_s28, 4  ;;  %s487_s0 = smov [#allocation7]   ;;  %s20_s29 = int_to_ptr.vmem [resolvable:$true] %s19_s29 }
   0x8   :  { %25 = dma.hbm_to_vmem [thread:$0]  %s18_s25, 128, %s20_s29, [#allocation3], %s484_s26, %s484_s26, %s485_s27  }
   0x9   :  { %s47_s7 = sshll.u32 %s487_s0, 4  ;;  %s48_s7 = int_to_ptr.vmem [resolvable:$true] %s47_s7 }
   0xa   :  { %53 = dma.hbm_to_vmem [thread:$0]  %s46_s1, 1024, %s48_s7, [#allocation6], %s484_s26, %s484_s26, %s485_s27  }
   0xb   :  { %477 = dma.done.wait [#allocation3], 128  }
   0xc   :  { %478 = vsyncadd [#allocation3], 4294967168 }
   0xd   :  { %479 = dma.done.wait [#allocation6], 2048  }
   0xe   :  { %480 = vsyncadd [#allocation6], 4294965248  ;;  %v357_v0 = vld [vmem:[#allocation5 + $0x38] sm:$0xff]  ;;  %v356_v1 = vld [vmem:[#allocation5 + $0x30] sm:$0xff]  ;;  %s488_s10 = smov [#allocation8]   ;;  %s267_s14 = sshll.u32 %s554_s5, 4  ;;  %s268_s14 = int_to_ptr.hbm [resolvable:$true] %s267_s14 }
   0xf   :  { %143 = vmatpush.bf16.msra.mxu0 %v357_v0  ;;  %v355_v2 = vld [vmem:[#allocation5 + $0x28] sm:$0xff]  ;;  %v354_v3 = vld [vmem:[#allocation5 + $0x20] sm:$0xff]  ;;  %v353_v4 = vld [vmem:[#allocation5 + $0x18] sm:$0xff]  ;;  %s265_s11 = sshll.u32 %s488_s10, 4  ;;  %s266_s11 = int_to_ptr.vmem [resolvable:$true] %s265_s11 }
  0x10   :  { %v352_v5 = vld [vmem:[#allocation5 + $0x10] sm:$0xff]  ;;  %v351_v6 = vld [vmem:[#allocation5 + $0x8] sm:$0xff]  ;;  %v350_v7 = vld [vmem:[#allocation5] sm:$0xff] }
  0x11   :  { %v349_v8 = vld [vmem:[#allocation2] sm:$0xff]  ;;  %v364_v10 = vld [vmem:[#allocation7 + $0x30] sm:$0xff]  ;;  %v363_v11 = vld [vmem:[#allocation7 + $0x28] sm:$0xff] }
  0x12   :  { %v365_v9 = vld [vmem:[#allocation7 + $0x38] sm:$0xff]  ;;  %v362_v12 = vld [vmem:[#allocation7 + $0x20] sm:$0xff]  ;;  %v360_v14 = vld [vmem:[#allocation7 + $0x10] sm:$0xff] }
  0x13   :  { %144 = vmatpush.bf16.msra.mxu0 %v356_v1  ;;  %243 = vmatpush.bf16.msra.mxu1 %v365_v9  ;;  %v361_v13 = vld [vmem:[#allocation7 + $0x18] sm:$0xff]  ;;  %v359_v16 = vld [vmem:[#allocation7 + $0x8] sm:$0xff]  ;;  %v358_v18 = vld [vmem:[#allocation7] sm:$0xff] }
  0x14   :  { %v86_v15 = vld [vmem:[%s551_s2] sm:$0x1] }
  0x15   :  { %v87_v17 = vunpack.c.l.bf16 %v86_v15  ;;  %v192_v43 = vld [vmem:[%s553_s4] sm:$0x1] }
  0x16   :  { %v193_v45 = vunpack.c.l.bf16 %v192_v43 }
  0x17   :  { %145 = vmatpush.bf16.msra.mxu0 %v355_v2  ;;  %244 = vmatpush.bf16.msra.mxu1 %v364_v10  ;;  %v88_v19 = vperm.slane %v87_v17, 0 }
  0x18   :  { %v194_v46 = vperm.slane %v193_v45, 0 }
  0x1b   :  { %146 = vmatpush.bf16.msra.mxu0 %v354_v3  ;;  %245 = vmatpush.bf16.msra.mxu1 %v363_v11 }
  0x1f   :  { %147 = vmatpush.bf16.msra.mxu0 %v353_v4  ;;  %246 = vmatpush.bf16.msra.mxu1 %v362_v12 }
  0x23   :  { %148 = vmatpush.bf16.msra.mxu0 %v352_v5  ;;  %247 = vmatpush.bf16.msra.mxu1 %v361_v13 }
  0x27   :  { %149 = vmatpush.bf16.msra.mxu0 %v351_v6  ;;  %248 = vmatpush.bf16.msra.mxu1 %v360_v14 }
  0x2b   :  { %150 = vmatpush.bf16.msra.mxu0 %v350_v7  ;;  %249 = vmatpush.bf16.msra.mxu1 %v359_v16 }
  0x2e   :  { %151 = vmatmul.bf16.vlgmr.msra.gmra.mxu0 %v349_v8 }
  0x2f   :  { %250 = vmatpush.bf16.msra.mxu1 %v358_v18 }
  0xab   :  { %v152_v20 = vpop.f32.mrf.mxu0 }
  0xac   :  { %v153_v21 = vadd.f32 %v152_v20, %v88_v19 }
  0xae   :  { %v157_v22 = vmul.f32 0.044715, %v153_v21  ;;  %v167_v37 = vmul.f32 0.5, %v153_v21 }
  0xb0   :  { %v159_v23 = vmul.f32 %v157_v22, %v153_v21 }
  0xb2   :  { %v161_v24 = vmul.f32 %v159_v23, %v153_v21 }
  0xb3   :  { %v154_v25 = vpop.f32.mrf.mxu0 }
  0xb4   :  { %v155_v26 = vadd.f32 %v154_v25, %v88_v19  ;;  %v163_v27 = vadd.f32 %v161_v24, %v153_v21 }
  0xb6   :  { %v158_v28 = vmul.f32 0.044715, %v155_v26  ;;  %v165_v30 = vmul.f32 0.7978846, %v163_v27  ;;  %v168_v38 = vmul.f32 0.5, %v155_v26 }
  0xb8   :  { %v160_v29 = vmul.f32 %v158_v28, %v155_v26  ;;  %377 = vtanh.f32 %v165_v30 }
  0xba   :  { %v162_v31 = vmul.f32 %v160_v29, %v155_v26 }
  0xbc   :  { %v164_v32 = vadd.f32 %v162_v31, %v155_v26 }
  0xbe   :  { %v166_v33 = vmul.f32 0.7978846, %v164_v32  ;;  %v378_v34 = vpop.eup %377 }
  0xbf   :  { %v171_v35 = vadd.f32 1.0, %v378_v34 }
  0xc0   :  { %379 = vtanh.f32 %v166_v33 }
  0xc1   :  { %v173_v40 = vmul.f32 %v171_v35, %v167_v37 }
  0xc6   :  { %v380_v36 = vpop.eup %379 }
  0xc7   :  { %v172_v39 = vadd.f32 1.0, %v380_v36 }
  0xc9   :  { %v174_v41 = vmul.f32 %v172_v39, %v168_v38 }
  0xcb   :  { %v175_v42 = vpack.c.bf16 %v174_v41, %v173_v40 }
  0xcd   :  { %251 = vmatmul.bf16.vlgmr.msra.gmra.mxu1 %v175_v42 }
 0x14a   :  { %v252_v44 = vpop.f32.mrf.mxu1 }
 0x14b   :  { %v253_v48 = vadd.f32 %v252_v44, %v194_v46 }
 0x152   :  { %v254_v47 = vpop.f32.mrf.mxu1 }
 0x153   :  { %v255_v49 = vadd.f32 %v254_v47, %v194_v46 }
 0x155   :  { %v369_v50 = vpack.c.bf16 %v255_v49, %v253_v48 }
 0x157   :  { %370 = vst [vmem:[#allocation8] sm:$0xff] %v369_v50  }
 0x158   :  { %273 = dma.vmem_to_hbm [thread:$0]  %s266_s11, 128, %s268_s14, [#allocation4], %s484_s26, %s484_s26, %s485_s27  }
 0x159   :  { %481 = dma.done.wait [#allocation4], 128  }
 0x15a   :  { %482 = vsyncadd [#allocation4], 4294967168 }
 0x15b   :  { %278 = vsyncpa [#allocation3], 1 }
 0x15c   :  { %279 = vsyncpa [#allocation6], 1 }
 0x15d   :  { %280 = vsyncpa [#allocation4], 1 }

</bundles_post_ra>
